<compile_context>
chip_gen: v7x
topology: tpu7x:2x2x1
jax: 0.10.0
libtpu: 0.0.40
codegen_flags: <defaults>
</compile_context>

<pallas_src>
import functools

import jax
import jax.numpy as jnp
from jax import lax
from jax.experimental import pallas as pl
from jax.experimental.pallas import tpu as pltpu


_LOG_CLAMP = -100.0  # torch.nn.BCELoss clamps log at -100 so p in {0,1} stays finite


# ---------------------------------------------------------------------------
# Kernel: per-chunk partial BCE sums (PyTorch nn.BCELoss semantics)
# ---------------------------------------------------------------------------
def _bce_partial_kernel(p_ref, t_ref, o_ref, *, total_rows, chunk_rows):
    # p_ref / t_ref: (chunk_rows, 128) tiles in the caller's dtype
    # o_ref:         (1, 8, 128) f32 partial-sum tile for this chunk
    c = pl.program_id(0)
    p = p_ref[...].astype(jnp.float32)          # in-kernel upcast (free on VPU)
    t = t_ref[...].astype(jnp.float32)

    log_p = jnp.maximum(jnp.log(p), _LOG_CLAMP)
    log_1mp = jnp.maximum(jnp.log(1.0 - p), _LOG_CLAMP)
    bce = -(t * log_p + (1.0 - t) * log_1mp)    # (chunk_rows, 128)

    if total_rows % chunk_rows != 0:
        # Last chunk's block extends past the array: zero the out-of-range rows.
        # (Garbage / NaN in those rows is discarded by the select.)
        row = lax.broadcasted_iota(jnp.int32, (chunk_rows, 128), 0) + c * chunk_rows
        bce = jnp.where(row < total_rows, bce, 0.0)

    # Elementwise (VALU) reduction down to one (8,128) vreg-sized tile;
    # the reshape is tile-aligned (chunk_rows is a multiple of 16) -> no copy.
    o_ref[0] = jnp.sum(bce.reshape(-1, 8, 128), axis=0)


# ---------------------------------------------------------------------------
# Wrapper: mean(-(t*log(p) + (1-t)*log(1-p))) with PyTorch's -100 log clamp
# ---------------------------------------------------------------------------
def bce_loss_pallas(y_pred, y_true):
    n = y_pred.size
    p = y_pred.reshape(-1)                      # metadata-only for contiguous inputs
    t = y_true.reshape(-1)

    n_main = (n // 128) * 128
    rows = n_main // 128

    # Rare non-128-aligned tail (<128 elements): plain jnp, negligible cost.
    tail = jnp.float32(0.0)
    if n_main < n:
        pt = p[n_main:].astype(jnp.float32)
        tt = t[n_main:].astype(jnp.float32)
        tail = jnp.sum(-(tt * jnp.maximum(jnp.log(pt), _LOG_CLAMP)
                         + (1.0 - tt) * jnp.maximum(jnp.log(1.0 - pt), _LOG_CLAMP)))

    if rows == 0:
        return tail / jnp.float32(n)

    if n_main < n:
        p2 = p[:n_main].reshape(rows, 128)
        t2 = t[:n_main].reshape(rows, 128)
    else:
        p2 = p.reshape(rows, 128)               # zero-copy view
        t2 = t.reshape(rows, 128)

    # Block sizing: up to 2048 rows (1 MiB/input at f32, 512 KiB at bf16),
    # multiple of 16 so bf16 inputs tile cleanly.  2 inputs x 2 buffers fits
    # comfortably in every generation's default scoped-VMEM limit.
    chunk_rows = min(2048, ((rows + 15) // 16) * 16)
    n_chunks = pl.cdiv(rows, chunk_rows)

    bytes_in = n_main * (p2.dtype.itemsize + t2.dtype.itemsize)
    cost = pl.CostEstimate(
        flops=7 * n_main,
        transcendentals=2 * n_main,
        bytes_accessed=bytes_in + n_chunks * 8 * 128 * 4,
    )

    kernel = functools.partial(
        _bce_partial_kernel, total_rows=rows, chunk_rows=chunk_rows)

    partials = pl.pallas_call(
        kernel,
        out_shape=jax.ShapeDtypeStruct((n_chunks, 8, 128), jnp.float32),
        grid=(n_chunks,),
        in_specs=[pl.BlockSpec((chunk_rows, 128), lambda c: (c, 0)),
                  pl.BlockSpec((chunk_rows, 128), lambda c: (c, 0))],
        out_specs=pl.BlockSpec((1, 8, 128), lambda c: (c, 0, 0)),
        compiler_params=pltpu.CompilerParams(
            dimension_semantics=("parallel",)),     # no shared accumulator -> safe
        cost_estimate=cost,
    )(p2, t2)

    # Tiny final reduction + mean in the wrapper (count is static: n).
    return (jnp.sum(partials) + tail) / jnp.float32(n)


# ---------------------------------------------------------------------------
# sem_loss_function.forward(y_true, y_pred) -> BCELoss(y_pred, y_true)
# ---------------------------------------------------------------------------
def sem_loss_forward(y_true, y_pred):
    return bce_loss_pallas(y_pred, y_true)


# ---------------------------------------------------------------------------
if __name__ == "__main__":
    key = jax.random.PRNGKey(0)
    k1, k2 = jax.random.split(key, 2)

    # small shapes consistent with a segmentation-style BCE: (B, C, H, W)
    B, C, H, W = 2, 4, 16, 16
    y_pred = jax.nn.sigmoid(jax.random.normal(k1, (B, C, H, W), dtype=jnp.float32))
    y_true = jax.random.uniform(k2, (B, C, H, W), dtype=jnp.float32)

    loss = sem_loss_forward(y_true, y_pred)
    jax.block_until_ready(loss)

    # pure-JAX reference (same math as torch.nn.BCELoss, mean reduction)
    ref = jnp.mean(
        -(y_true * jnp.maximum(jnp.log(y_pred), -100.0)
          + (1.0 - y_true) * jnp.maximum(jnp.log(1.0 - y_pred), -100.0)))
    assert jnp.allclose(loss, ref, rtol=1e-5, atol=1e-6), (loss, ref)

    print("KERNEL_OK")
</pallas_src>

<mosaic_0001>
module attributes {stable_mosaic.version = 11 : i64} {
  func.func @_bce_partial_kernel(%arg0: i32, %arg1: memref<16x128xf32, #tpu.memory_space<vmem>>, %arg2: memref<16x128xf32, #tpu.memory_space<vmem>>, %arg3: memref<1x8x128xf32, #tpu.memory_space<vmem>>) attributes {dimension_semantics = [#tpu.dimension_semantics<parallel>], iteration_bounds = array<i64: 1>, scalar_prefetch = 0 : i64, scratch_operands = 0 : i64, tpu.core_type = #tpu.core_type<tc>, window_params = [{transform_indices = @transform_0, window_bounds = array<i64: 16, 128>}, {transform_indices = @transform_1, window_bounds = array<i64: 16, 128>}, {transform_indices = @transform_2, window_bounds = array<i64: 1, 8, 128>}]} {
    %c0 = arith.constant 0 : index
    %c0_0 = arith.constant 0 : index
    %0 = vector.load %arg1[%c0, %c0_0] : memref<16x128xf32, #tpu.memory_space<vmem>>, vector<16x128xf32>
    %c0_1 = arith.constant 0 : index
    %c0_2 = arith.constant 0 : index
    %1 = vector.load %arg2[%c0_1, %c0_2] : memref<16x128xf32, #tpu.memory_space<vmem>>, vector<16x128xf32>
    %2 = math.log %0 : vector<16x128xf32>
    %cst = arith.constant -1.000000e+02 : f32
    %3 = vector.broadcast %cst : f32 to vector<16x128xf32>
    %4 = arith.maximumf %2, %3 : vector<16x128xf32>
    %cst_3 = arith.constant 1.000000e+00 : f32
    %5 = vector.broadcast %cst_3 : f32 to vector<16x128xf32>
    %6 = arith.subf %5, %0 : vector<16x128xf32>
    %7 = math.log %6 : vector<16x128xf32>
    %cst_4 = arith.constant -1.000000e+02 : f32
    %8 = vector.broadcast %cst_4 : f32 to vector<16x128xf32>
    %9 = arith.maximumf %7, %8 : vector<16x128xf32>
    %10 = arith.mulf %1, %4 : vector<16x128xf32>
    %cst_5 = arith.constant 1.000000e+00 : f32
    %11 = vector.broadcast %cst_5 : f32 to vector<16x128xf32>
    %12 = arith.subf %11, %1 : vector<16x128xf32>
    %13 = arith.mulf %12, %9 : vector<16x128xf32>
    %14 = arith.addf %10, %13 : vector<16x128xf32>
    %cst_6 = arith.constant 0.000000e+00 : f32
    %15 = vector.broadcast %cst_6 : f32 to vector<16x128xf32>
    %16 = arith.subf %15, %14 : vector<16x128xf32>
    %17 = vector.shape_cast %16 : vector<16x128xf32> to vector<2x8x128xf32>
    %cst_7 = arith.constant dense<0.000000e+00> : vector<8x128xf32>
    %18 = vector.multi_reduction <add>, %17, %cst_7 [0] : vector<2x8x128xf32> to vector<8x128xf32>
    %c0_8 = arith.constant 0 : index
    %c0_9 = arith.constant 0 : index
    %c0_10 = arith.constant 0 : index
    %19 = vector.load %arg3[%c0_8, %c0_9, %c0_10] : memref<1x8x128xf32, #tpu.memory_space<vmem>>, vector<1x8x128xf32>
    %20 = vector.shape_cast %19 : vector<1x8x128xf32> to vector<8x128xf32>
    %21 = vector.shape_cast %18 : vector<8x128xf32> to vector<1x8x128xf32>
    tpu.vector_store %arg3[%c0_8, %c0_9, %c0_10], %21 {strides = array<i32>} : memref<1x8x128xf32, #tpu.memory_space<vmem>>, vector<1x8x128xf32>,
    return
  }
  func.func @transform_0(%arg0: i32) -> (i32, i32) {
    %c0_i32 = arith.constant 0 : i32
    %c0_i32_0 = arith.constant 0 : i32
    return %arg0, %c0_i32 : i32, i32
  }
  func.func @transform_1(%arg0: i32) -> (i32, i32) {
    %c0_i32 = arith.constant 0 : i32
    %c0_i32_0 = arith.constant 0 : i32
    return %arg0, %c0_i32 : i32, i32
  }
  func.func @transform_2(%arg0: i32) -> (i32, i32, i32) {
    %c0_i32 = arith.constant 0 : i32
    %c0_i32_0 = arith.constant 0 : i32
    %c0_i32_1 = arith.constant 0 : i32
    return %arg0, %c0_i32, %c0_i32_0 : i32, i32, i32
  }
}

</mosaic_0001>

<bundles_post_ra>
// kernel: tpu_custom_call.1
= control target key start
LH: loop header
LB: loop body
LE: loop exit
PB: predicated region body
PF: predicated region fallthrough
CT: control target
= control target key end

     0   :  { %7 = vsyncpa [#allocation3], 0  ;;  %s227_s0 = inlined_call_operand.hbm [shape: f32[16,128], index: 0, kind: input, shape index: {}]   ;;  %s228_s1 = inlined_call_operand.hbm [shape: f32[16,128], index: 1, kind: input, shape index: {}]   ;;  %s229_s2 = inlined_call_operand.hbm [shape: f32[1,8,128], index: 2, kind: output, shape index: {}]  }
   0x1   :  { %8 = vsyncpa [#allocation6], 0 }
   0x2   :  { %9 = vsyncpa [#allocation4], 0  ;;  %s171_s9 = smov [#allocation2]   ;;  %s99_s13 = scalar_lea.hbm %s227_s0, 256 }
   0x3   :  { %s15_s10 = sshll.u32 %s171_s9, 4  ;;  %p100_p0 = scmp.ne.s32.totalorder %s227_s0, %s99_s13  ;;  %s16_s10 = int_to_ptr.vmem [resolvable:$true] %s15_s10 }
   0x4   :  { %p103_p1 = scmp.lt.u32.totalorder %s99_s13, %s227_s0 }
   0x6   :  { %p105_p2 = pnand %p103_p1, %p100_p0 }
   0x8   :  { %108 = shalt.err (!%p105_p2)
}
   0x9   :  { %s109_s18 = scalar_lea.vmem %s16_s10, 256  ;;  %p114_p4 = scmp.lt.s32.totalorder %s16_s10, %s16_s10 }
   0xa   :  { %p110_p3 = scmp.ne.s32.totalorder %s16_s10, %s109_s18  ;;  %p115_p5 = scmp.lt.s32.totalorder %s109_s18, %s109_s18 }
   0xc   :  { %p116_p6 = por %p115_p5, %p114_p4 }
   0xe   :  { %p117_p7 = pnand %p116_p6, %p110_p3 }
  0x10   :  { %120 = shalt.err (!%p117_p7)
}
  0x11   :  { %s172_s19 = smov 128   ;;  %s173_s20 = smov 8  }
  0x12   :  { %21 = dma.hbm_to_vmem [thread:$0]  %s227_s0, 256, %s16_s10, [#allocation3], %s172_s19, %s172_s19, %s173_s20  }
  0x13   :  { %s174_s23 = smov [#allocation5]   ;;  %s121_s27 = scalar_lea.hbm %s228_s1, 256 }
  0x14   :  { %s27_s24 = sshll.u32 %s174_s23, 4  ;;  %p122_p8 = scmp.ne.s32.totalorder %s228_s1, %s121_s27  ;;  %s28_s24 = int_to_ptr.vmem [resolvable:$true] %s27_s24 }
  0x15   :  { %p125_p9 = scmp.lt.u32.totalorder %s121_s27, %s228_s1 }
  0x17   :  { %p127_p10 = pnand %p125_p9, %p122_p8 }
  0x19   :  { %130 = shalt.err (!%p127_p10)
}
  0x1a   :  { %s131_s4 = scalar_lea.vmem %s28_s24, 256  ;;  %p136_p12 = scmp.lt.s32.totalorder %s28_s24, %s28_s24 }
  0x1b   :  { %p132_p11 = scmp.ne.s32.totalorder %s28_s24, %s131_s4  ;;  %p137_p13 = scmp.lt.s32.totalorder %s131_s4, %s131_s4 }
  0x1d   :  { %p138_p0 = por %p137_p13, %p136_p12 }
  0x1f   :  { %p139_p1 = pnand %p138_p0, %p132_p11 }
  0x21   :  { %142 = shalt.err (!%p139_p1)
}
  0x22   :  { %33 = dma.hbm_to_vmem [thread:$0]  %s228_s1, 256, %s28_s24, [#allocation6], %s172_s19, %s172_s19, %s173_s20  }
  0x23   :  { %165 = dma.done.wait [#allocation3], 256  }
  0x24   :  { %166 = vsyncadd [#allocation3], 4294967040 }
  0x25   :  { %167 = dma.done.wait [#allocation6], 256  }
  0x26   :  { %168 = vsyncadd [#allocation6], 4294967040  ;;  %v40_v0 = vld [vmem:[#allocation2] sm:$0xff]  ;;  %v41_v1 = vld [vmem:[#allocation2 + $0x8] sm:$0xff]  ;;  %s175_s1 = smov [#allocation7]  }
  0x27   :  { %91 = vlog2.f32 %v40_v0  ;;  %v50_v2 = vsub.f32 1.0, %v40_v0  ;;  %v51_v3 = vsub.f32 1.0, %v41_v1  ;;  %v42_v5 = vld [vmem:[#allocation5] sm:$0xff]  ;;  %v43_v7 = vld [vmem:[#allocation5 + $0x8] sm:$0xff]  ;;  %s76_s6 = sshll.u32 %s175_s1, 4  ;;  %s77_s6 = int_to_ptr.vmem [resolvable:$true] %s76_s6 }
  0x28   :  { %93 = vlog2.f32 %v41_v1  ;;  %v60_v14 = vsub.f32 1.0, %v42_v5  ;;  %v61_v17 = vsub.f32 1.0, %v43_v7  ;;  %s143_s7 = scalar_lea.vmem %s77_s6, 128  ;;  %p148_p3 = scmp.lt.s32.totalorder %s77_s6, %s77_s6 }
  0x29   :  { %95 = vlog2.f32 %v50_v2  ;;  %p144_p2 = scmp.ne.s32.totalorder %s77_s6, %s143_s7  ;;  %p149_p4 = scmp.lt.s32.totalorder %s143_s7, %s143_s7 }
  0x2a   :  { %97 = vlog2.f32 %v51_v3 }
  0x2b   :  { %p150_p5 = por %p149_p4, %p148_p3 }
  0x2d   :  { %p151_p6 = pnand %p150_p5, %p144_p2 }
  0x31   :  { %v92_v4 = vpop.eup %91 }
  0x32   :  { %v94_v6 = vpop.eup %93  ;;  %v45_v8 = vmul.f32 0.6931472, %v92_v4 }
  0x33   :  { %v96_v9 = vpop.eup %95  ;;  %v47_v10 = vmul.f32 0.6931472, %v94_v6 }
  0x34   :  { %v98_v11 = vpop.eup %97  ;;  %v48_v12 = vmax.f32 %v45_v8, -100.0  ;;  %v53_v13 = vmul.f32 0.6931472, %v96_v9 }
  0x35   :  { %v49_v15 = vmax.f32 %v47_v10, -100.0  ;;  %v55_v16 = vmul.f32 0.6931472, %v98_v11 }
  0x36   :  { %v56_v18 = vmax.f32 %v53_v13, -100.0  ;;  %v58_v19 = vmul.f32 %v48_v12, %v42_v5 }
  0x37   :  { %v57_v20 = vmax.f32 %v55_v16, -100.0  ;;  %v59_v21 = vmul.f32 %v49_v15, %v43_v7 }
  0x38   :  { %v62_v22 = vmul.f32 %v60_v14, %v56_v18 }
  0x39   :  { %v63_v23 = vmul.f32 %v61_v17, %v57_v20 }
  0x3a   :  { %v64_v24 = vadd.f32 %v62_v22, %v58_v19 }
  0x3b   :  { %v65_v25 = vadd.f32 %v63_v23, %v59_v21 }
  0x3c   :  { %v66_v26 = vsub.f32 0.0, %v64_v24 }
  0x3d   :  { %v67_v27 = vsub.f32 0.0, %v65_v25 }
  0x3f   :  { %v68_v28 = vadd.f32 %v67_v27, %v66_v26 }
  0x41   :  { %69 = vst [vmem:[#allocation7] sm:$0xff] %v68_v28 }
  0x42   :  { %154 = shalt.err (!%p151_p6)
}
  0x43   :  { %s155_s10 = scalar_lea.hbm %s229_s2, 128 }
  0x44   :  { %p156_p7 = scmp.ne.s32.totalorder %s229_s2, %s155_s10  ;;  %p159_p8 = scmp.lt.u32.totalorder %s155_s10, %s229_s2 }
  0x46   :  { %p161_p9 = pnand %p159_p8, %p156_p7 }
  0x48   :  { %164 = shalt.err (!%p161_p9)
}
  0x49   :  { %79 = dma.vmem_to_hbm [thread:$0]  %s77_s6, 128, %s229_s2, [#allocation4]  }
  0x4a   :  { %169 = dma.done.wait [#allocation4], 128  }
  0x4b   :  { %170 = vsyncadd [#allocation4], 4294967168 }
  0x4c   :  { %83 = vsyncpa [#allocation3], 1 }
  0x4d   :  { %84 = vsyncpa [#allocation6], 1 }
  0x4e   :  { %85 = vsyncpa [#allocation4], 1 }

</bundles_post_ra>
